<compile_context>
chip_gen: v5e
topology: v5e:2x2
jax: 0.10.0
libtpu: 0.0.40
codegen_flags: <defaults>
</compile_context>

<pallas_src>
import jax
import jax.numpy as jnp
from jax.experimental import pallas as pl
from jax.experimental.pallas import tpu as pltpu

# Flat offsets of each parameter inside the packed 47-float SMEM vector.
_W1, _B1 = 0, 24          # w1: (6, 4) row-major, b1: (4,)
_W2, _B2 = 28, 40         # w2: (4, 3) row-major, b2: (3,)
_W3, _B3 = 43, 46         # w3: (3, 1) row-major, b3: (1,)
_NPARAMS = 47


def _mlp_kernel(p_ref, x_ref, o_ref):
    """p_ref: (47,) f32 in SMEM (whole-array resident).
    x_ref:  (6, Bt) f32 VMEM tile -- row k is input feature k, batch on lanes.
    o_ref:  (1, Bt) f32 lane-dense output tile."""
    # Feature rows as lane-dense (1, Bt) vectors (static slices -> cheap views).
    x = [x_ref[k:k + 1, :] for k in range(6)]

    # Layer 1: h1[j] = relu(sum_k w1[k, j] * x[k] + b1[j]),  j = 0..3   (VPU)
    h1 = []
    for j in range(4):
        acc = x[0] * p_ref[_W1 + j]
        for k in range(1, 6):
            acc = acc + x[k] * p_ref[_W1 + k * 4 + j]
        h1.append(jnp.maximum(acc + p_ref[_B1 + j], 0.0))

    # Layer 2: h2[j] = relu(sum_k w2[k, j] * h1[k] + b2[j]),  j = 0..2
    h2 = []
    for j in range(3):
        acc = h1[0] * p_ref[_W2 + j]
        for k in range(1, 4):
            acc = acc + h1[k] * p_ref[_W2 + k * 3 + j]
        h2.append(jnp.maximum(acc + p_ref[_B2 + j], 0.0))

    # Layer 3: out = sum_k w3[k, 0] * h2[k] + b3[0]
    acc = h2[0] * p_ref[_W3 + 0]
    acc = acc + h2[1] * p_ref[_W3 + 1]
    acc = acc + h2[2] * p_ref[_W3 + 2]
    o_ref[...] = acc + p_ref[_B3]


def _pack_params(params):
    """Pack all weights/biases into one (47,) f32 vector (SMEM-friendly)."""
    return jnp.concatenate([
        params["w1"].reshape(-1), params["b1"].reshape(-1),
        params["w2"].reshape(-1), params["b2"].reshape(-1),
        params["w3"].reshape(-1), params["b3"].reshape(-1),
    ]).astype(jnp.float32)


def _reference_forward(x, params):
    """Plain-JAX forward (same math as the PyTorch module; weights are [in, out])."""
    h1 = jnp.maximum(x @ params["w1"] + params["b1"].reshape(1, -1), 0.0)
    h2 = jnp.maximum(h1 @ params["w2"] + params["b2"].reshape(1, -1), 0.0)
    return h2 @ params["w3"] + params["b3"].reshape(1, -1)


def action_conditioned_ff_pallas(x, params, *, bt=512):
    """Pallas forward. x: (B, 6) f32; weights stored [in, out]. Returns (B, 1)."""
    B, F = x.shape
    assert F == 6, "Action_Conditioned_FF expects 6 input features"
    assert bt % 128 == 0, "batch tile must be a multiple of 128 lanes"

    # Pad batch to a lane multiple; clamp the tile so tiny batches do not
    # inflate padding, then make the padded batch a multiple of the tile.
    b_pad = pl.cdiv(B, 128) * 128
    bt = min(bt, b_pad)
    b_pad = pl.cdiv(b_pad, bt) * bt

    pvec = _pack_params(params)                       # (47,) -> SMEM resident
    # Layout flip in the wrapper: (B, 6) -> (6, B), pad batch so every lane
    # tile is full-width.  Only the 6 real feature rows are ever DMA'd.
    xt = jnp.transpose(x.astype(jnp.float32))         # (6, B)
    xt = jnp.pad(xt, ((0, 0), (0, b_pad - B)))        # (6, b_pad)

    out_t = pl.pallas_call(
        _mlp_kernel,
        out_shape=jax.ShapeDtypeStruct((1, b_pad), jnp.float32),
        grid_spec=pltpu.PrefetchScalarGridSpec(
            num_scalar_prefetch=0,
            grid=(b_pad // bt,),
            in_specs=[
                pl.BlockSpec(memory_space=pltpu.MemorySpace.SMEM),   # 47 scalars
                pl.BlockSpec((6, bt), lambda i: (0, i)),             # activations
            ],
            out_specs=pl.BlockSpec((1, bt), lambda i: (0, i)),
        ),
        compiler_params=pltpu.CompilerParams(
            dimension_semantics=("parallel",),        # batch tiles are independent
        ),
    )(pvec, xt)

    return out_t[0, :B].reshape(B, 1)


def action_conditioned_ff(x, params, *, min_pallas_batch=1024, bt=512):
    """Dispatcher: tiny batches go to plain XLA (pallas_call overhead dominates)."""
    if x.shape[0] < min_pallas_batch:
        return _reference_forward(x, params)
    return action_conditioned_ff_pallas(x, params, bt=bt)


def init_params(key):
    """Deterministic init mimicking nn.Linear's U(-1/sqrt(fan_in), 1/sqrt(fan_in))."""
    sizes = [(6, 4), (4, 3), (3, 1)]
    params = {}
    for i, (fan_in, fan_out) in enumerate(sizes, start=1):
        key, kw, kb = jax.random.split(key, 3)
        bound = 1.0 / (fan_in ** 0.5)
        params[f"w{i}"] = jax.random.uniform(
            kw, (fan_in, fan_out), jnp.float32, -bound, bound)
        params[f"b{i}"] = jax.random.uniform(
            kb, (fan_out,), jnp.float32, -bound, bound)
    return params


if __name__ == "__main__":
    key = jax.random.PRNGKey(0)
    key, kx = jax.random.split(key)

    B = 256  # small batch; bt=128 -> grid of 2 steps exercises the pipeline
    x = jax.random.normal(kx, (B, 6), dtype=jnp.float32)
    params = init_params(key)

    fwd = jax.jit(lambda xx: action_conditioned_ff_pallas(xx, params, bt=128))
    out = jax.block_until_ready(fwd(x))

    ref = _reference_forward(x, params)
    assert out.shape == (B, 1)
    assert jnp.allclose(out, ref, atol=1e-5, rtol=1e-5), "mismatch vs reference"

    # TODO(synk): `evaluate()` (DataLoader-driven loss loop) is host-side glue,
    # not a kernel; it is intentionally not translated.
    print("KERNEL_OK")
</pallas_src>

<mosaic_0001>
module attributes {stable_mosaic.version = 11 : i64} {
  func.func @_mlp_kernel(%arg0: i32, %arg1: memref<47xf32, #tpu.memory_space<smem>>, %arg2: memref<6x128xf32, #tpu.memory_space<vmem>>, %arg3: memref<1x128xf32, #tpu.memory_space<vmem>>) attributes {dimension_semantics = [#tpu.dimension_semantics<parallel>], iteration_bounds = array<i64: 2>, scalar_prefetch = 0 : i64, scratch_operands = 0 : i64, tpu.core_type = #tpu.core_type<tc>, window_params = [{transform_indices = @transform_0, window_bounds = array<i64: 47>}, {transform_indices = @transform_1, window_bounds = array<i64: 6, 128>}, {transform_indices = @transform_2, window_bounds = array<i64: 1, 128>}]} {
    %c0 = arith.constant 0 : index
    %c0_0 = arith.constant 0 : index
    %0 = vector.load %arg2[%c0, %c0_0] : memref<6x128xf32, #tpu.memory_space<vmem>>, vector<1x128xf32>
    %c1 = arith.constant 1 : index
    %c0_1 = arith.constant 0 : index
    %1 = vector.load %arg2[%c1, %c0_1] : memref<6x128xf32, #tpu.memory_space<vmem>>, vector<1x128xf32>
    %c2 = arith.constant 2 : index
    %c0_2 = arith.constant 0 : index
    %2 = vector.load %arg2[%c2, %c0_2] : memref<6x128xf32, #tpu.memory_space<vmem>>, vector<1x128xf32>
    %c3 = arith.constant 3 : index
    %c0_3 = arith.constant 0 : index
    %3 = vector.load %arg2[%c3, %c0_3] : memref<6x128xf32, #tpu.memory_space<vmem>>, vector<1x128xf32>
    %c4 = arith.constant 4 : index
    %c0_4 = arith.constant 0 : index
    %4 = vector.load %arg2[%c4, %c0_4] : memref<6x128xf32, #tpu.memory_space<vmem>>, vector<1x128xf32>
    %c5 = arith.constant 5 : index
    %c0_5 = arith.constant 0 : index
    %5 = vector.load %arg2[%c5, %c0_5] : memref<6x128xf32, #tpu.memory_space<vmem>>, vector<1x128xf32>
    %c0_6 = arith.constant 0 : index
    %6 = memref.load %arg1[%c0_6] : memref<47xf32, #tpu.memory_space<smem>>
    %7 = vector.broadcast %6 : f32 to vector<1x128xf32>
    %8 = arith.mulf %0, %7 : vector<1x128xf32>
    %c4_7 = arith.constant 4 : index
    %9 = memref.load %arg1[%c4_7] : memref<47xf32, #tpu.memory_space<smem>>
    %10 = vector.broadcast %9 : f32 to vector<1x128xf32>
    %11 = arith.mulf %1, %10 : vector<1x128xf32>
    %12 = arith.addf %8, %11 : vector<1x128xf32>
    %c8 = arith.constant 8 : index
    %13 = memref.load %arg1[%c8] : memref<47xf32, #tpu.memory_space<smem>>
    %14 = vector.broadcast %13 : f32 to vector<1x128xf32>
    %15 = arith.mulf %2, %14 : vector<1x128xf32>
    %16 = arith.addf %12, %15 : vector<1x128xf32>
    %c12 = arith.constant 12 : index
    %17 = memref.load %arg1[%c12] : memref<47xf32, #tpu.memory_space<smem>>
    %18 = vector.broadcast %17 : f32 to vector<1x128xf32>
    %19 = arith.mulf %3, %18 : vector<1x128xf32>
    %20 = arith.addf %16, %19 : vector<1x128xf32>
    %c16 = arith.constant 16 : index
    %21 = memref.load %arg1[%c16] : memref<47xf32, #tpu.memory_space<smem>>
    %22 = vector.broadcast %21 : f32 to vector<1x128xf32>
    %23 = arith.mulf %4, %22 : vector<1x128xf32>
    %24 = arith.addf %20, %23 : vector<1x128xf32>
    %c20 = arith.constant 20 : index
    %25 = memref.load %arg1[%c20] : memref<47xf32, #tpu.memory_space<smem>>
    %26 = vector.broadcast %25 : f32 to vector<1x128xf32>
    %27 = arith.mulf %5, %26 : vector<1x128xf32>
    %28 = arith.addf %24, %27 : vector<1x128xf32>
    %c24 = arith.constant 24 : index
    %29 = memref.load %arg1[%c24] : memref<47xf32, #tpu.memory_space<smem>>
    %30 = vector.broadcast %29 : f32 to vector<1x128xf32>
    %31 = arith.addf %28, %30 : vector<1x128xf32>
    %cst = arith.constant 0.000000e+00 : f32
    %32 = vector.broadcast %cst : f32 to vector<1x128xf32>
    %33 = arith.maximumf %31, %32 : vector<1x128xf32>
    %c1_8 = arith.constant 1 : index
    %34 = memref.load %arg1[%c1_8] : memref<47xf32, #tpu.memory_space<smem>>
    %35 = vector.broadcast %34 : f32 to vector<1x128xf32>
    %36 = arith.mulf %0, %35 : vector<1x128xf32>
    %c5_9 = arith.constant 5 : index
    %37 = memref.load %arg1[%c5_9] : memref<47xf32, #tpu.memory_space<smem>>
    %38 = vector.broadcast %37 : f32 to vector<1x128xf32>
    %39 = arith.mulf %1, %38 : vector<1x128xf32>
    %40 = arith.addf %36, %39 : vector<1x128xf32>
    %c9 = arith.constant 9 : index
    %41 = memref.load %arg1[%c9] : memref<47xf32, #tpu.memory_space<smem>>
    %42 = vector.broadcast %41 : f32 to vector<1x128xf32>
    %43 = arith.mulf %2, %42 : vector<1x128xf32>
    %44 = arith.addf %40, %43 : vector<1x128xf32>
    %c13 = arith.constant 13 : index
    %45 = memref.load %arg1[%c13] : memref<47xf32, #tpu.memory_space<smem>>
    %46 = vector.broadcast %45 : f32 to vector<1x128xf32>
    %47 = arith.mulf %3, %46 : vector<1x128xf32>
    %48 = arith.addf %44, %47 : vector<1x128xf32>
    %c17 = arith.constant 17 : index
    %49 = memref.load %arg1[%c17] : memref<47xf32, #tpu.memory_space<smem>>
    %50 = vector.broadcast %49 : f32 to vector<1x128xf32>
    %51 = arith.mulf %4, %50 : vector<1x128xf32>
    %52 = arith.addf %48, %51 : vector<1x128xf32>
    %c21 = arith.constant 21 : index
    %53 = memref.load %arg1[%c21] : memref<47xf32, #tpu.memory_space<smem>>
    %54 = vector.broadcast %53 : f32 to vector<1x128xf32>
    %55 = arith.mulf %5, %54 : vector<1x128xf32>
    %56 = arith.addf %52, %55 : vector<1x128xf32>
    %c25 = arith.constant 25 : index
    %57 = memref.load %arg1[%c25] : memref<47xf32, #tpu.memory_space<smem>>
    %58 = vector.broadcast %57 : f32 to vector<1x128xf32>
    %59 = arith.addf %56, %58 : vector<1x128xf32>
    %cst_10 = arith.constant 0.000000e+00 : f32
    %60 = vector.broadcast %cst_10 : f32 to vector<1x128xf32>
    %61 = arith.maximumf %59, %60 : vector<1x128xf32>
    %c2_11 = arith.constant 2 : index
    %62 = memref.load %arg1[%c2_11] : memref<47xf32, #tpu.memory_space<smem>>
    %63 = vector.broadcast %62 : f32 to vector<1x128xf32>
    %64 = arith.mulf %0, %63 : vector<1x128xf32>
    %c6 = arith.constant 6 : index
    %65 = memref.load %arg1[%c6] : memref<47xf32, #tpu.memory_space<smem>>
    %66 = vector.broadcast %65 : f32 to vector<1x128xf32>
    %67 = arith.mulf %1, %66 : vector<1x128xf32>
    %68 = arith.addf %64, %67 : vector<1x128xf32>
    %c10 = arith.constant 10 : index
    %69 = memref.load %arg1[%c10] : memref<47xf32, #tpu.memory_space<smem>>
    %70 = vector.broadcast %69 : f32 to vector<1x128xf32>
    %71 = arith.mulf %2, %70 : vector<1x128xf32>
    %72 = arith.addf %68, %71 : vector<1x128xf32>
    %c14 = arith.constant 14 : index
    %73 = memref.load %arg1[%c14] : memref<47xf32, #tpu.memory_space<smem>>
    %74 = vector.broadcast %73 : f32 to vector<1x128xf32>
    %75 = arith.mulf %3, %74 : vector<1x128xf32>
    %76 = arith.addf %72, %75 : vector<1x128xf32>
    %c18 = arith.constant 18 : index
    %77 = memref.load %arg1[%c18] : memref<47xf32, #tpu.memory_space<smem>>
    %78 = vector.broadcast %77 : f32 to vector<1x128xf32>
    %79 = arith.mulf %4, %78 : vector<1x128xf32>
    %80 = arith.addf %76, %79 : vector<1x128xf32>
    %c22 = arith.constant 22 : index
    %81 = memref.load %arg1[%c22] : memref<47xf32, #tpu.memory_space<smem>>
    %82 = vector.broadcast %81 : f32 to vector<1x128xf32>
    %83 = arith.mulf %5, %82 : vector<1x128xf32>
    %84 = arith.addf %80, %83 : vector<1x128xf32>
    %c26 = arith.constant 26 : index
    %85 = memref.load %arg1[%c26] : memref<47xf32, #tpu.memory_space<smem>>
    %86 = vector.broadcast %85 : f32 to vector<1x128xf32>
    %87 = arith.addf %84, %86 : vector<1x128xf32>
    %cst_12 = arith.constant 0.000000e+00 : f32
    %88 = vector.broadcast %cst_12 : f32 to vector<1x128xf32>
    %89 = arith.maximumf %87, %88 : vector<1x128xf32>
    %c3_13 = arith.constant 3 : index
    %90 = memref.load %arg1[%c3_13] : memref<47xf32, #tpu.memory_space<smem>>
    %91 = vector.broadcast %90 : f32 to vector<1x128xf32>
    %92 = arith.mulf %0, %91 : vector<1x128xf32>
    %c7 = arith.constant 7 : index
    %93 = memref.load %arg1[%c7] : memref<47xf32, #tpu.memory_space<smem>>
    %94 = vector.broadcast %93 : f32 to vector<1x128xf32>
    %95 = arith.mulf %1, %94 : vector<1x128xf32>
    %96 = arith.addf %92, %95 : vector<1x128xf32>
    %c11 = arith.constant 11 : index
    %97 = memref.load %arg1[%c11] : memref<47xf32, #tpu.memory_space<smem>>
    %98 = vector.broadcast %97 : f32 to vector<1x128xf32>
    %99 = arith.mulf %2, %98 : vector<1x128xf32>
    %100 = arith.addf %96, %99 : vector<1x128xf32>
    %c15 = arith.constant 15 : index
    %101 = memref.load %arg1[%c15] : memref<47xf32, #tpu.memory_space<smem>>
    %102 = vector.broadcast %101 : f32 to vector<1x128xf32>
    %103 = arith.mulf %3, %102 : vector<1x128xf32>
    %104 = arith.addf %100, %103 : vector<1x128xf32>
    %c19 = arith.constant 19 : index
    %105 = memref.load %arg1[%c19] : memref<47xf32, #tpu.memory_space<smem>>
    %106 = vector.broadcast %105 : f32 to vector<1x128xf32>
    %107 = arith.mulf %4, %106 : vector<1x128xf32>
    %108 = arith.addf %104, %107 : vector<1x128xf32>
    %c23 = arith.constant 23 : index
    %109 = memref.load %arg1[%c23] : memref<47xf32, #tpu.memory_space<smem>>
    %110 = vector.broadcast %109 : f32 to vector<1x128xf32>
    %111 = arith.mulf %5, %110 : vector<1x128xf32>
    %112 = arith.addf %108, %111 : vector<1x128xf32>
    %c27 = arith.constant 27 : index
    %113 = memref.load %arg1[%c27] : memref<47xf32, #tpu.memory_space<smem>>
    %114 = vector.broadcast %113 : f32 to vector<1x128xf32>
    %115 = arith.addf %112, %114 : vector<1x128xf32>
    %cst_14 = arith.constant 0.000000e+00 : f32
    %116 = vector.broadcast %cst_14 : f32 to vector<1x128xf32>
    %117 = arith.maximumf %115, %116 : vector<1x128xf32>
    %c28 = arith.constant 28 : index
    %118 = memref.load %arg1[%c28] : memref<47xf32, #tpu.memory_space<smem>>
    %119 = vector.broadcast %118 : f32 to vector<1x128xf32>
    %120 = arith.mulf %33, %119 : vector<1x128xf32>
    %c31 = arith.constant 31 : index
    %121 = memref.load %arg1[%c31] : memref<47xf32, #tpu.memory_space<smem>>
    %122 = vector.broadcast %121 : f32 to vector<1x128xf32>
    %123 = arith.mulf %61, %122 : vector<1x128xf32>
    %124 = arith.addf %120, %123 : vector<1x128xf32>
    %c34 = arith.constant 34 : index
    %125 = memref.load %arg1[%c34] : memref<47xf32, #tpu.memory_space<smem>>
    %126 = vector.broadcast %125 : f32 to vector<1x128xf32>
    %127 = arith.mulf %89, %126 : vector<1x128xf32>
    %128 = arith.addf %124, %127 : vector<1x128xf32>
    %c37 = arith.constant 37 : index
    %129 = memref.load %arg1[%c37] : memref<47xf32, #tpu.memory_space<smem>>
    %130 = vector.broadcast %129 : f32 to vector<1x128xf32>
    %131 = arith.mulf %117, %130 : vector<1x128xf32>
    %132 = arith.addf %128, %131 : vector<1x128xf32>
    %c40 = arith.constant 40 : index
    %133 = memref.load %arg1[%c40] : memref<47xf32, #tpu.memory_space<smem>>
    %134 = vector.broadcast %133 : f32 to vector<1x128xf32>
    %135 = arith.addf %132, %134 : vector<1x128xf32>
    %cst_15 = arith.constant 0.000000e+00 : f32
    %136 = vector.broadcast %cst_15 : f32 to vector<1x128xf32>
    %137 = arith.maximumf %135, %136 : vector<1x128xf32>
    %c29 = arith.constant 29 : index
    %138 = memref.load %arg1[%c29] : memref<47xf32, #tpu.memory_space<smem>>
    %139 = vector.broadcast %138 : f32 to vector<1x128xf32>
    %140 = arith.mulf %33, %139 : vector<1x128xf32>
    %c32 = arith.constant 32 : index
    %141 = memref.load %arg1[%c32] : memref<47xf32, #tpu.memory_space<smem>>
    %142 = vector.broadcast %141 : f32 to vector<1x128xf32>
    %143 = arith.mulf %61, %142 : vector<1x128xf32>
    %144 = arith.addf %140, %143 : vector<1x128xf32>
    %c35 = arith.constant 35 : index
    %145 = memref.load %arg1[%c35] : memref<47xf32, #tpu.memory_space<smem>>
    %146 = vector.broadcast %145 : f32 to vector<1x128xf32>
    %147 = arith.mulf %89, %146 : vector<1x128xf32>
    %148 = arith.addf %144, %147 : vector<1x128xf32>
    %c38 = arith.constant 38 : index
    %149 = memref.load %arg1[%c38] : memref<47xf32, #tpu.memory_space<smem>>
    %150 = vector.broadcast %149 : f32 to vector<1x128xf32>
    %151 = arith.mulf %117, %150 : vector<1x128xf32>
    %152 = arith.addf %148, %151 : vector<1x128xf32>
    %c41 = arith.constant 41 : index
    %153 = memref.load %arg1[%c41] : memref<47xf32, #tpu.memory_space<smem>>
    %154 = vector.broadcast %153 : f32 to vector<1x128xf32>
    %155 = arith.addf %152, %154 : vector<1x128xf32>
    %cst_16 = arith.constant 0.000000e+00 : f32
    %156 = vector.broadcast %cst_16 : f32 to vector<1x128xf32>
    %157 = arith.maximumf %155, %156 : vector<1x128xf32>
    %c30 = arith.constant 30 : index
    %158 = memref.load %arg1[%c30] : memref<47xf32, #tpu.memory_space<smem>>
    %159 = vector.broadcast %158 : f32 to vector<1x128xf32>
    %160 = arith.mulf %33, %159 : vector<1x128xf32>
    %c33 = arith.constant 33 : index
    %161 = memref.load %arg1[%c33] : memref<47xf32, #tpu.memory_space<smem>>
    %162 = vector.broadcast %161 : f32 to vector<1x128xf32>
    %163 = arith.mulf %61, %162 : vector<1x128xf32>
    %164 = arith.addf %160, %163 : vector<1x128xf32>
    %c36 = arith.constant 36 : index
    %165 = memref.load %arg1[%c36] : memref<47xf32, #tpu.memory_space<smem>>
    %166 = vector.broadcast %165 : f32 to vector<1x128xf32>
    %167 = arith.mulf %89, %166 : vector<1x128xf32>
    %168 = arith.addf %164, %167 : vector<1x128xf32>
    %c39 = arith.constant 39 : index
    %169 = memref.load %arg1[%c39] : memref<47xf32, #tpu.memory_space<smem>>
    %170 = vector.broadcast %169 : f32 to vector<1x128xf32>
    %171 = arith.mulf %117, %170 : vector<1x128xf32>
    %172 = arith.addf %168, %171 : vector<1x128xf32>
    %c42 = arith.constant 42 : index
    %173 = memref.load %arg1[%c42] : memref<47xf32, #tpu.memory_space<smem>>
    %174 = vector.broadcast %173 : f32 to vector<1x128xf32>
    %175 = arith.addf %172, %174 : vector<1x128xf32>
    %cst_17 = arith.constant 0.000000e+00 : f32
    %176 = vector.broadcast %cst_17 : f32 to vector<1x128xf32>
    %177 = arith.maximumf %175, %176 : vector<1x128xf32>
    %c43 = arith.constant 43 : index
    %178 = memref.load %arg1[%c43] : memref<47xf32, #tpu.memory_space<smem>>
    %179 = vector.broadcast %178 : f32 to vector<1x128xf32>
    %180 = arith.mulf %137, %179 : vector<1x128xf32>
    %c44 = arith.constant 44 : index
    %181 = memref.load %arg1[%c44] : memref<47xf32, #tpu.memory_space<smem>>
    %182 = vector.broadcast %181 : f32 to vector<1x128xf32>
    %183 = arith.mulf %157, %182 : vector<1x128xf32>
    %184 = arith.addf %180, %183 : vector<1x128xf32>
    %c45 = arith.constant 45 : index
    %185 = memref.load %arg1[%c45] : memref<47xf32, #tpu.memory_space<smem>>
    %186 = vector.broadcast %185 : f32 to vector<1x128xf32>
    %187 = arith.mulf %177, %186 : vector<1x128xf32>
    %188 = arith.addf %184, %187 : vector<1x128xf32>
    %c46 = arith.constant 46 : index
    %189 = memref.load %arg1[%c46] : memref<47xf32, #tpu.memory_space<smem>>
    %190 = vector.broadcast %189 : f32 to vector<1x128xf32>
    %191 = arith.addf %188, %190 : vector<1x128xf32>
    %c0_18 = arith.constant 0 : index
    %c0_19 = arith.constant 0 : index
    %192 = vector.load %arg3[%c0_18, %c0_19] : memref<1x128xf32, #tpu.memory_space<vmem>>, vector<1x128xf32>
    tpu.vector_store %arg3[%c0_18, %c0_19], %191 {strides = array<i32>} : memref<1x128xf32, #tpu.memory_space<vmem>>, vector<1x128xf32>,
    return
  }
  func.func @transform_0(%arg0: i32) -> i32 {
    %c0_i32 = arith.constant 0 : i32
    %c0_i32_0 = arith.constant 0 : i32
    return %c0_i32 : i32
  }
  func.func @transform_1(%arg0: i32) -> (i32, i32) {
    %c0_i32 = arith.constant 0 : i32
    %c0_i32_0 = arith.constant 0 : i32
    return %c0_i32, %arg0 : i32, i32
  }
  func.func @transform_2(%arg0: i32) -> (i32, i32) {
    %c0_i32 = arith.constant 0 : i32
    %c0_i32_0 = arith.constant 0 : i32
    return %c0_i32, %arg0 : i32, i32
  }
}

</mosaic_0001>

<bundles_post_ra>
// kernel: _lambda_.1
= control target key start
LH: loop header
LB: loop body
LE: loop exit
PB: predicated region body
PF: predicated region fallthrough
CT: control target
= control target key end

     0   :  { %7 = vsyncpa [#allocation5], 0  ;;  %s917_s0 = inlined_call_operand.vmem [shape: f32[47], index: 0, kind: input, shape index: {}]   ;;  %s918_s1 = inlined_call_operand.hbm [shape: f32[6,256], index: 1, kind: input, shape index: {}]   ;;  %s919_s2 = inlined_call_operand.hbm [shape: f32[1,256], index: 2, kind: output, shape index: {}]  }
   0x1   :  { %8 = vsyncpa [#allocation3], 0 }
   0x2   :  { %10 = vsyncpa [#allocation3 + $0x1], 0 }
   0x3   :  { %11 = vsyncpa [#allocation4], 0 }
   0x4   :  { %13 = vsyncpa [#allocation4 + $0x1], 0  ;;  %s698_s9 = smov 0   ;;  %s700_s10 = smov 0  }
   0x5   :  { %s702_s11 = smov 0   ;;  %s704_s12 = smov 0  }
   0x6 LB: > { %s719_s13 = sadd.s32 4294967295, %s680_s12   ;;  %s451_s14 = sadd.s32 4294967294, %s680_s12   ;;  %s680_s12 = sphi %s704_s12, %s929_s12   ;;  %s676_s11 = sphi %s702_s11, %s928_s11   ;;  %s672_s10 = sphi %s700_s10, %s927_s10   ;;  %s668_s9 = sphi %s698_s9, %s926_s9  }
   0x7   : > { %p60_p0 = scmp.ne.s32.totalorder %s672_s10, %s668_s9  ;;  %p61_p1 = scmp.eq.s32.totalorder %s719_s13, 0 }
   0x8   : > { %p84_p2 = scmp.eq.s32.totalorder %s719_s13, 1  ;;  %p90_p3 = scmp.eq.s32.totalorder %s451_s14, 1 }
   0x9   : > { %p728_p4 = por %p61_p1, %p60_p0  ;;  %p452_p5 = scmp.ge.s32.totalorder %s680_s12, 1 }
   0xa   : > { %p733_p6 = por %p90_p3, %p60_p0  ;;  %p97_p7 = scmp.lt.s32.totalorder %s680_s12, 3 }
   0xb   : > { %s109_s19 = sshll.u32 %s917_s0, 4  ;;  %s749_s21 = sadd.s32 1, %s680_s12   ;;  %s110_s19 = int_to_ptr.vmem [resolvable:$true] %s109_s19 }
   0xc   : > { %p741_p8 = pnand %p452_p5, %p97_p7  ;;  %s44_s22 = ssub.s32 %s680_s12, %s749_s21 }
   0xd   : > { %p45_p12 = scmp.eq.s32.totalorder %s44_s22, 0  ;;  %s47_s23 = sadd.s32 1, %s676_s11 }
   0xe   : > { %p516_p10 = pneg %p741_p8  ;;  %p54_p13 = scmp.ne.s32.totalorder %s676_s11, %s672_s10 }
   0xf   : > { %s682_s24 = smov [#allocation2]   ;;  %p55_p0 = scmp.eq.s32.totalorder %s680_s12, 0 }
  0x10   : > { %p517_p11 = pnand %p516_p10, %p61_p1  ;;  %p764_p3 = por %p84_p2, %p54_p13 }
  0x11   : > { %s759_s25 = scalar_select %p45_p12, %s676_s11, %s47_s23  }
  0x12   : > { %519 = dma.vmem_to_smem (!%p517_p11), %s110_s19, 16, %s682_s24, [#allocation5]  }
  0x13   : > { %s120_s27 = sand.u32 1, %s676_s11   ;;  %p56_p5 = por %p55_p0, %p54_p13 }
  0x14   : > { %p529_p7 = scmp.lt.s32.totalorder %s680_s12, 2  ;;  %s455_s28 = sshll.u32 %s120_s27, 3 }
  0x15   : > { %s456_s29 = sshll.u32 %s680_s12, 3  ;;  %s124_s6 = scalar_lea.vmem [#allocation6], %s455_s28 }
  0x16   : > { %s128_s4 = scalar_lea.hbm %s918_s1, %s456_s29  ;;  %s132_s7 = sshll.u32 %s124_s6, 4  ;;  %s133_s7 = int_to_ptr.vmem [resolvable:$true] %s132_s7 }
  0x17   : > { %s130_s5 = sshll.u32 %s128_s4, 4  ;;  %p774_p10 = pnand %p529_p7, %p56_p5  ;;  %s131_s5 = int_to_ptr.hbm [resolvable:$true] %s130_s5 }
  0x18   : > { %s121_s14 = scalar_lea.sflag [#allocation3], %s120_s27  ;;  %s580_s17 = sshra.s32 %s131_s5, 4  ;;  %s581_s17 = int_to_ptr.hbm [resolvable:$true] %s580_s17 }
  0x19   : > { %s582_s18 = scalar_lea.hbm %s581_s17, 8  ;;  %p584_p11 = pneg %p774_p10 }
  0x1a   : > { %p583_p2 = scmp.ne.s32.totalorder %s581_s17, %s582_s18  ;;  %s587_s23 = scalar_lea.hbm %s918_s1, 16 }
  0x1b   : > { %p588_p0 = scmp.lt.s32.totalorder %s581_s17, %s918_s1  ;;  %p589_p5 = scmp.lt.s32.totalorder %s587_s23, %s582_s18 }
  0x1c   : > { %p585_p12 = pnand %p584_p11, %p583_p2 }
  0x1d   : > { %p590_p7 = por %p589_p5, %p588_p0 }
  0x1e   : > { %p586_p13 = pneg %p585_p12 }
  0x20   : > { %p591_p9 = pnand %p590_p7, %p586_p13 }
  0x22   : > { %594 = shalt.err (!%p591_p9)
}
  0x23   : > { %523 = dma.hbm_to_vmem [thread:$0]  (!%p774_p10), %s131_s5, 128, %s133_s7, %s121_s14  }
  0x24   : > { %141 = sbr.rel (%p741_p8) target bundleno = 116 (0x74), region = 28 }
  0x29   : > { %655 = dma.done.wait (%p61_p1), [#allocation5], 16  }
  0x2a   : > { %657 = vsyncadd (%p61_p1), [#allocation5], 4294967280  ;;  %s795_s27 = sand.u32 1, %s672_s10  }
  0x2b   : > { %s459_s29 = sshll.u32 %s795_s27, 3  ;;  %s149_s30 = scalar_lea.sflag [#allocation3], %s795_s27 }
  0x2c   : > { %s799_s3 = scalar_lea.vmem [#allocation6], %s459_s29 }
  0x2d   : > { %659 = dma.done.wait (%p728_p4), %s149_s30, 128  }
  0x2e   : > { %661 = vsyncadd (%p728_p4), %s149_s30, 4294967168 }
  0x2f   : > { %158 = sfence }
  0x30   : > { %s180_s20 = sld [smem:[#allocation2]]  ;;  %v806_v0 = vld [vmem:[%s799_s3] sm:$0x1]  ;;  %v809_v1 = vld [vmem:[%s799_s3 + $0x1] sm:$0x1] }
  0x31   : > { %s460_s4 = sld [smem:[#allocation2 + $0x4]]  ;;  %v814_v2 = vld [vmem:[%s799_s3 + $0x2] sm:$0x1]  ;;  %v819_v4 = vld [vmem:[%s799_s3 + $0x3] sm:$0x1] }
  0x32   : > { %s461_s5 = sld [smem:[#allocation2 + $0x8]]  ;;  %v826_v13 = vld [vmem:[%s799_s3 + $0x4] sm:$0x1]  ;;  %v833_v21 = vld [vmem:[%s799_s3 + $0x5] sm:$0x1] }
  0x33   : > { %s462_s6 = sld [smem:[#allocation2 + $0xc]] }
  0x34   : > { %s463_s7 = sld [smem:[#allocation2 + $0x10]] }
  0x35   : > { %s811_s8 = sld [smem:[#allocation2 + $0x14]] }
  0x36   : > { %v181_v3 = vstv %s180_s20  ;;  %s816_s15 = sld [smem:[#allocation2 + $0x18]] }
  0x37   : > { %v182_v5 = vmul.f32 %v181_v3, %v806_v0  ;;  %v184_v6 = vstv %s460_s4  ;;  %s466_s14 = sld [smem:[#allocation2 + $0x1]] }
  0x38   : > { %v185_v7 = vmul.f32 %v184_v6, %v809_v1  ;;  %v188_v8 = vstv %s461_s5  ;;  %s467_s17 = sld [smem:[#allocation2 + $0x5]] }
  0x39   : > { %v189_v9 = vmul.f32 %v188_v8, %v814_v2  ;;  %v192_v10 = vstv %s462_s6  ;;  %s468_s18 = sld [smem:[#allocation2 + $0x9]] }
  0x3a   : > { %v186_v11 = vadd.f32 %v185_v7, %v182_v5  ;;  %v193_v12 = vmul.f32 %v192_v10, %v819_v4  ;;  %s469_s19 = sld [smem:[#allocation2 + $0xd]]  ;;  %v196_v14 = vstv %s463_s7 }
  0x3b   : > { %s470_s22 = sld [smem:[#allocation2 + $0x11]]  ;;  %v197_v18 = vmul.f32 %v196_v14, %v826_v13  ;;  %v200_v22 = vstv %s811_s8 }
  0x3c   : > { %v190_v15 = vadd.f32 %v189_v9, %v186_v11  ;;  %s471_s23 = sld [smem:[#allocation2 + $0x15]]  ;;  %v201_v31 = vmul.f32 %v200_v22, %v833_v21  ;;  %v204_v43 = vstv %s816_s15 }
  0x3d   : > { %v208_v16 = vstv %s466_s14  ;;  %s828_s24 = sld [smem:[#allocation2 + $0x19]] }
  0x3e   : > { %v194_v17 = vadd.f32 %v193_v12, %v190_v15  ;;  %v209_v19 = vmul.f32 %v208_v16, %v806_v0  ;;  %v211_v20 = vstv %s467_s17  ;;  %s473_s28 = sld [smem:[#allocation2 + $0x2]] }
  0x3f   : > { %v212_v23 = vmul.f32 %v211_v20, %v809_v1  ;;  %v215_v24 = vstv %s468_s18  ;;  %s474_s29 = sld [smem:[#allocation2 + $0x6]] }
  0x40   : > { %v216_v25 = vmul.f32 %v215_v24, %v814_v2  ;;  %v219_v26 = vstv %s469_s19  ;;  %s475_s30 = sld [smem:[#allocation2 + $0xa]]  ;;  %v198_v30 = vadd.f32 %v197_v18, %v194_v17 }
  0x41   : > { %v213_v27 = vadd.f32 %v212_v23, %v209_v19  ;;  %v220_v28 = vmul.f32 %v219_v26, %v819_v4  ;;  %v223_v29 = vstv %s470_s22  ;;  %s476_s20 = sld [smem:[#allocation2 + $0xe]] }
  0x42   : > { %v227_v32 = vstv %s471_s23  ;;  %s477_s3 = sld [smem:[#allocation2 + $0x12]]  ;;  %v224_v34 = vmul.f32 %v223_v29, %v826_v13  ;;  %v202_v40 = vadd.f32 %v201_v31, %v198_v30 }
  0x43   : > { %v217_v33 = vadd.f32 %v216_v25, %v213_v27  ;;  %s478_s4 = sld [smem:[#allocation2 + $0x16]]  ;;  %v228_v37 = vmul.f32 %v227_v32, %v833_v21  ;;  %v231_v51 = vstv %s828_s24 }
  0x44   : > { %v235_v35 = vstv %s473_s28  ;;  %s841_s5 = sld [smem:[#allocation2 + $0x1a]]  ;;  %v205_v53 = vadd.f32 %v204_v43, %v202_v40 }
  0x45   : > { %v221_v36 = vadd.f32 %v220_v28, %v217_v33  ;;  %v236_v38 = vmul.f32 %v235_v35, %v806_v0  ;;  %v238_v39 = vstv %s474_s29  ;;  %s480_s6 = sld [smem:[#allocation2 + $0x3]] }
  0x46   : > { %v239_v41 = vmul.f32 %v238_v39, %v809_v1  ;;  %v242_v42 = vstv %s475_s30  ;;  %s481_s7 = sld [smem:[#allocation2 + $0x7]]  ;;  %v206_v3 = vmax.f32 %v205_v53, 0.0 }
  0x47   : > { %v225_v44 = vadd.f32 %v224_v34, %v221_v36  ;;  %v243_v45 = vmul.f32 %v242_v42, %v814_v2  ;;  %v246_v46 = vstv %s476_s20  ;;  %s482_s8 = sld [smem:[#allocation2 + $0xb]] }
  0x48   : > { %v240_v47 = vadd.f32 %v239_v41, %v236_v38  ;;  %v247_v48 = vmul.f32 %v246_v46, %v819_v4  ;;  %v250_v49 = vstv %s477_s3  ;;  %s483_s14 = sld [smem:[#allocation2 + $0xf]] }
  0x49   : > { %v229_v50 = vadd.f32 %v228_v37, %v225_v44  ;;  %v254_v52 = vstv %s478_s4  ;;  %s850_s17 = sld [smem:[#allocation2 + $0x13]]  ;;  %v251_v55 = vmul.f32 %v250_v49, %v826_v13 }
  0x4a   : > { %v244_v54 = vadd.f32 %v243_v45, %v240_v47  ;;  %s853_s15 = sld [smem:[#allocation2 + $0x17]]  ;;  %v255_v56 = vmul.f32 %v254_v52, %v833_v21  ;;  %v258_v8 = vstv %s841_s5 }
  0x4b   : > { %v262_v57 = vstv %s480_s6  ;;  %s856_s18 = sld [smem:[#allocation2 + $0x1b]]  ;;  %v232_v58 = vadd.f32 %v231_v51, %v229_v50 }
  0x4c   : > { %v248_v59 = vadd.f32 %v247_v48, %v244_v54  ;;  %v263_v60 = vmul.f32 %v262_v57, %v806_v0  ;;  %v265_v61 = vstv %s481_s7  ;;  %s487_s19 = sld [smem:[#allocation2 + $0x1c]] }
  0x4d   : > { %v266_v62 = vmul.f32 %v265_v61, %v809_v1  ;;  %v269_v63 = vstv %s482_s8  ;;  %s488_s22 = sld [smem:[#allocation2 + $0x1f]]  ;;  %v233_v0 = vmax.f32 %v232_v58, 0.0 }
  0x4e   : > { %v252_v5 = vadd.f32 %v251_v55, %v248_v59  ;;  %v270_v6 = vmul.f32 %v269_v63, %v814_v2  ;;  %v273_v7 = vstv %s483_s14  ;;  %s861_s23 = sld [smem:[#allocation2 + $0x22]] }
  0x4f   : > { %v267_v9 = vadd.f32 %v266_v62, %v263_v60  ;;  %v274_v10 = vmul.f32 %v273_v7, %v819_v4  ;;  %v277_v11 = vstv %s850_s17  ;;  %s866_s24 = sld [smem:[#allocation2 + $0x25]] }
  0x50   : > { %v256_v12 = vadd.f32 %v255_v56, %v252_v5  ;;  %v281_v1 = vstv %s853_s15  ;;  %s869_s28 = sld [smem:[#allocation2 + $0x28]]  ;;  %v278_v15 = vmul.f32 %v277_v11, %v826_v13 }
  0x51   : > { %v271_v14 = vadd.f32 %v270_v6, %v267_v9  ;;  %s492_s29 = sld [smem:[#allocation2 + $0x1d]]  ;;  %v282_v4 = vmul.f32 %v281_v1, %v833_v21  ;;  %v285_v13 = vstv %s856_s18 }
  0x52   : > { %v259_v2 = vadd.f32 %v258_v8, %v256_v12  ;;  %v289_v16 = vstv %s487_s19  ;;  %s493_s30 = sld [smem:[#allocation2 + $0x20]] }
  0x53   : > { %v275_v17 = vadd.f32 %v274_v10, %v271_v14  ;;  %v290_v18 = vmul.f32 %v289_v16, %v206_v3  ;;  %v292_v19 = vstv %s488_s22  ;;  %s494_s20 = sld [smem:[#allocation2 + $0x23]] }
  0x54   : > { %v260_v20 = vmax.f32 %v259_v2, 0.0  ;;  %v293_v22 = vmul.f32 %v292_v19, %v233_v0  ;;  %v296_v23 = vstv %s861_s23  ;;  %s495_s3 = sld [smem:[#allocation2 + $0x26]] }
  0x55   : > { %v279_v24 = vadd.f32 %v278_v15, %v275_v17  ;;  %s874_s4 = sld [smem:[#allocation2 + $0x29]]  ;;  %v300_v33 = vstv %s866_s24  ;;  %s369_s24 = scalar_lea.hbm %s919_s2, %s719_s13 }
  0x56   : > { %s497_s5 = sld [smem:[#allocation2 + $0x1e]]  ;;  %v294_v26 = vadd.f32 %v293_v22, %v290_v18  ;;  %v297_v27 = vmul.f32 %v296_v23, %v260_v20  ;;  %v304_v44 = vstv %s869_s28  ;;  %s173_s28 = scalar_lea.vmem [#allocation7], %s795_s27 }
  0x57   : > { %v283_v25 = vadd.f32 %v282_v4, %v279_v24  ;;  %v308_v28 = vstv %s492_s29  ;;  %s498_s6 = sld [smem:[#allocation2 + $0x21]]  ;;  %s371_s29 = sshll.u32 %s173_s28, 4  ;;  %s372_s29 = int_to_ptr.vmem [resolvable:$true] %s371_s29 }
  0x58   : > { %v309_v29 = vmul.f32 %v308_v28, %v206_v3  ;;  %v311_v21 = vstv %s493_s30  ;;  %s499_s7 = sld [smem:[#allocation2 + $0x24]]  ;;  %v298_v37 = vadd.f32 %v297_v27, %v294_v26  ;;  %s373_s30 = sshll.u32 %s369_s24, 4  ;;  %s374_s30 = int_to_ptr.hbm [resolvable:$true] %s373_s30 }
  0x59   : > { %v286_v30 = vadd.f32 %v285_v13, %v283_v25  ;;  %v312_v31 = vmul.f32 %v311_v21, %v233_v0  ;;  %v315_v32 = vstv %s494_s20  ;;  %s500_s8 = sld [smem:[#allocation2 + $0x27]]  ;;  %s361_s20 = scalar_lea.sflag [#allocation4], %s795_s27 }
  0x5a   : > { %v316_v34 = vmul.f32 %v315_v32, %v260_v20  ;;  %v319_v35 = vstv %s495_s3  ;;  %s878_s14 = sld [smem:[#allocation2 + $0x2a]]  ;;  %s624_s3 = sshra.s32 %s374_s30, 4  ;;  %s625_s3 = int_to_ptr.hbm [resolvable:$true] %s624_s3 }
  0x5b   : > { %v287_v36 = vmax.f32 %v286_v30, 0.0  ;;  %v313_v38 = vadd.f32 %v312_v31, %v309_v29  ;;  %s502_s17 = sld [smem:[#allocation2 + $0x2b]]  ;;  %v323_v45 = vstv %s874_s4  ;;  %s626_s4 = scalar_lea.hbm %s625_s3, 1 }
  0x5c   : > { %v327_v39 = vstv %s497_s5  ;;  %s503_s15 = sld [smem:[#allocation2 + $0x2c]]  ;;  %p627_p1 = scmp.ne.s32.totalorder %s625_s3, %s626_s4 }
  0x5d   : > { %v301_v40 = vmul.f32 %v300_v33, %v287_v36  ;;  %v317_v41 = vadd.f32 %v316_v34, %v313_v38  ;;  %v320_v42 = vmul.f32 %v319_v35, %v287_v36  ;;  %v328_v43 = vmul.f32 %v327_v39, %v206_v3  ;;  %s504_s18 = sld [smem:[#allocation2 + $0x2d]]  ;;  %p631_p9 = scmp.lt.s32.totalorder %s625_s3, %s919_s2 }
  0x5e   : > { %v330_v46 = vstv %s498_s6  ;;  %v334_v47 = vstv %s499_s7  ;;  %s505_s19 = sld [smem:[#allocation2 + $0x2e]]  ;;  %p628_p4 = pnand %p627_p1, %p764_p3 }
  0x5f   : > { %v302_v48 = vadd.f32 %v301_v40, %v298_v37  ;;  %v321_v49 = vadd.f32 %v320_v42, %v317_v41  ;;  %v331_v50 = vmul.f32 %v330_v46, %v233_v0  ;;  %v335_v51 = vmul.f32 %v334_v47, %v260_v20  ;;  %s630_s6 = scalar_lea.hbm %s919_s2, 2 }
  0x60   : > { %v338_v52 = vstv %s500_s8  ;;  %v342_v62 = vstv %s878_s14  ;;  %p629_p8 = pneg %p628_p4  ;;  %p632_p10 = scmp.lt.s32.totalorder %s630_s6, %s626_s4 }
  0x61   : > { %v305_v53 = vadd.f32 %v304_v44, %v302_v48  ;;  %v324_v54 = vadd.f32 %v323_v45, %v321_v49  ;;  %v332_v55 = vadd.f32 %v331_v50, %v328_v43  ;;  %v339_v56 = vmul.f32 %v338_v52, %v287_v36 }
  0x62   : > { %v346_v57 = vstv %s502_s17  ;;  %v349_v58 = vstv %s503_s15  ;;  %p633_p2 = por %p632_p10, %p631_p9 }
  0x63   : > { %v306_v59 = vmax.f32 %v305_v53, 0.0  ;;  %v325_v60 = vmax.f32 %v324_v54, 0.0  ;;  %v336_v61 = vadd.f32 %v335_v51, %v332_v55  ;;  %v353_v7 = vstv %s504_s18 }
  0x64   : > { %v357_v11 = vstv %s505_s19  ;;  %p634_p11 = pnand %p633_p2, %p629_p8 }
  0x65   : > { %v340_v63 = vadd.f32 %v339_v56, %v336_v61  ;;  %v347_v3 = vmul.f32 %v346_v57, %v306_v59  ;;  %v350_v5 = vmul.f32 %v349_v58, %v325_v60 }
  0x67   : > { %v343_v6 = vadd.f32 %v342_v62, %v340_v63  ;;  %v351_v9 = vadd.f32 %v350_v5, %v347_v3 }
  0x69   : > { %v344_v8 = vmax.f32 %v343_v6, 0.0 }
  0x6b   : > { %v354_v10 = vmul.f32 %v353_v7, %v344_v8 }
  0x6d   : > { %v355_v0 = vadd.f32 %v354_v10, %v351_v9 }
  0x6f   : > { %v358_v12 = vadd.f32 %v357_v11, %v355_v0 }
  0x71   : > { %359 = vst [vmem:[%s173_s28] sm:$0x1] %v358_v12 }
  0x72   : > { %637 = shalt.err (!%p634_p11)
}
  0x73   : > { %514 = dma.vmem_to_hbm [thread:$0]  (%p764_p3), %s372_s29, 16, %s374_s30, %s361_s20  }
  0x74 PF: > { %s385_s27 = sand.u32 1, %s668_s9   ;;  %p925_p12 = scmp.ge.s32.totalorder %s680_s12, 2 }
  0x75   : > { %s386_s14 = scalar_lea.sflag [#allocation4], %s385_s27 }
  0x76   : > { %p525_p13 = pnand %p925_p12, %p733_p6 }
  0x78   : > { %p526_p0 = pneg %p525_p13 }
  0x7a   : > { %663 = dma.done.wait (%p526_p0), %s386_s14, 16  }
  0x7b   : > { %665 = vsyncadd (%p526_p0), %s386_s14, 4294967280  ;;  %p16_p5 = scmp.ge.s32.totalorder %s749_s21, 4   ;;  %s926_s9 = smov %s672_s10 }
  0x7c   : > { %s927_s10 = smov %s676_s11  ;;  %s928_s11 = smov %s759_s25 }
  0x7d   : > { %s929_s12 = smov %s749_s21  ;;  %18 = sbr.rel (!%p16_p5) target bundleno = 6 (0x6), region = 78 }
  0x82   :  { %391 = vsyncpa [#allocation3], 1 }
  0x83   :  { %393 = vsyncpa [#allocation3 + $0x1], 1 }
  0x84   :  { %394 = vsyncpa [#allocation4], 1 }
  0x85   :  { %396 = vsyncpa [#allocation4 + $0x1], 1 }
  0x86   :  { %397 = vsyncpa [#allocation5], 1 }
  0x87   :  { %399 = vsyncpa [#allocation5 + $0x1], 1 }

</bundles_post_ra>
